<compile_context>
chip_gen: v5e
topology: v5e:2x2
jax: 0.10.0
libtpu: 0.0.40
codegen_flags: <defaults>
</compile_context>

<pallas_src>
import jax
import jax.numpy as jnp
import numpy as np
from jax.experimental import pallas as pl
from jax.experimental.pallas import tpu as pltpu

EPS = 1e-5
OUT_W = 128                      # lane-dense output slab width (cols 0..6 valid)
VMEM_SPEC = pl.BlockSpec(memory_space=pltpu.MemorySpace.VMEM)

OUT_COLS = {
    "home_goals": (0, 1),
    "away_goals": (1, 2),
    "home_shot_attempts": (2, 3),
    "away_shot_attempts": (3, 4),
    "outcome_logits": (4, 7),
}


# ----------------------------------------------------------------------------- kernel
def fused_gnn_kernel(
    x_ref, a_ref, sel_ref,
    w_in_ref, t0_ref,
    w1_ref, t1_ref, w2_ref, t2_ref, w3_ref, t3_ref,
    hw1_ref, ht1_ref, hw2_ref, ht2_ref, hw3_ref, hb3_ref,
    out_ref,
):
    """Entire forward pass in one kernel (eval-mode BN pre-folded into weights/shifts)."""
    a = a_ref[...]

    # input BN + Linear + input BN + ReLU  (all folded -> matmul + shift + relu)
    h = jnp.dot(x_ref[...].astype(w_in_ref.dtype), w_in_ref[...],
                preferred_element_type=jnp.float32) + t0_ref[...]
    h = jnp.maximum(h, 0.0)

    def gcn_residual(h, w_ref, t_ref):
        hw = jnp.dot(h.astype(w_ref.dtype), w_ref[...],
                     preferred_element_type=jnp.float32)
        agg = jnp.dot(a, hw.astype(a_ref.dtype),
                      preferred_element_type=jnp.float32) + t_ref[...]
        return h + jnp.maximum(agg, 0.0)

    h = gcn_residual(h, w1_ref, t1_ref)
    h = gcn_residual(h, w2_ref, t2_ref)
    h = gcn_residual(h, w3_ref, t3_ref)

    # In-kernel gather of game nodes: one-hot selection matmul (MXU), h stays in VMEM.
    xg = jnp.dot(sel_ref[...], h.astype(sel_ref.dtype),
                 preferred_element_type=jnp.float32)

    # All 5 heads as 3 packed matmuls (W1 concat, W2/W3 block-diagonal).
    z = jnp.dot(xg.astype(hw1_ref.dtype), hw1_ref[...],
                preferred_element_type=jnp.float32) + ht1_ref[...]
    z = jnp.maximum(z, 0.0)
    z = jnp.dot(z.astype(hw2_ref.dtype), hw2_ref[...],
                preferred_element_type=jnp.float32) + ht2_ref[...]
    z = jnp.maximum(z, 0.0)
    out_ref[...] = jnp.dot(z.astype(hw3_ref.dtype), hw3_ref[...],
                           preferred_element_type=jnp.float32) + hb3_ref[...]


# ----------------------------------------------------------------------------- wrapper
def run_fused(x, a_hat, sel, p):
    num_games = sel.shape[0]
    cdt = p["w1"].dtype
    args = (
        x, a_hat.astype(cdt), sel.astype(cdt),
        p["w_in"], p["t0"],
        p["w1"], p["t1"], p["w2"], p["t2"], p["w3"], p["t3"],
        p["hw1"], p["ht1"], p["hw2"], p["ht2"], p["hw3"], p["hb3"],
    )
    return pl.pallas_call(
        fused_gnn_kernel,
        out_shape=jax.ShapeDtypeStruct((num_games, OUT_W), jnp.float32),
        in_specs=[VMEM_SPEC] * len(args),
        out_specs=VMEM_SPEC,
        compiler_params=pltpu.CompilerParams(vmem_limit_bytes=32 * 1024 * 1024),
    )(*args)


def multi_headed_hockey_gnn_forward(fused_params, x, a_hat, sel):
    """Forward pass. a_hat / sel are precomputed once for the static graph."""
    slab = run_fused(x, a_hat, sel, fused_params)     # (num_games, OUT_W) lane-dense
    return {name: slab[:, lo:hi] for name, (lo, hi) in OUT_COLS.items()}


# ----------------------------------------------------------------------------- graph glue (precomputed once)
def build_gcn_adj(edge_index, num_nodes):
    """Dense symmetric-normalized adjacency with self loops (GCNConv semantics)."""
    src, dst = edge_index
    a = jnp.zeros((num_nodes, num_nodes), jnp.float32)
    a = a.at[dst, src].add(1.0)
    a = a + jnp.eye(num_nodes, dtype=jnp.float32)
    deg = a.sum(axis=1)
    dinv = jax.lax.rsqrt(deg)
    return a * dinv[:, None] * dinv[None, :]


def build_game_selector(game_indices, num_nodes):
    """One-hot (num_games, num_nodes) matrix so x_games = sel @ h inside the kernel."""
    g = game_indices.shape[0]
    sel = jnp.zeros((g, num_nodes), jnp.float32)
    return sel.at[jnp.arange(g), game_indices].set(1.0)


# ----------------------------------------------------------------------------- param prep (BN folding + head packing)
def bn_fold(gamma, beta, mean, var, eps=EPS):
    scale = gamma * jax.lax.rsqrt(var + eps)
    shift = beta - mean * scale
    return scale, shift


def prepare_fused_params(raw, hidden, compute_dtype=jnp.float32):
    """Fold eval-mode BN into weights/shifts and pack the 5 heads into 3 matmuls.

    compute_dtype=jnp.bfloat16 can be used for large graphs (accumulation stays fp32)."""
    H, H2, H4 = hidden, hidden // 2, hidden // 4
    p = {}

    # input_feature_bn + input_linear + input_bn folded into one matmul + shift
    s_in, t_in = bn_fold(*raw["input_feature_bn"])
    s0, t0 = bn_fold(*raw["input_bn"])
    w_in, b_in = raw["input_linear"]
    p["w_in"] = ((s_in[:, None] * w_in) * s0[None, :]).astype(compute_dtype)
    p["t0"] = (((t_in @ w_in) + b_in) * s0 + t0).reshape(1, H).astype(jnp.float32)

    # GCN layers: BN scale folded into weight columns, bias*scale+shift fused
    for i in (1, 2, 3):
        w, b = raw[f"conv{i}"]
        s, t = bn_fold(*raw[f"bn{i}"])
        p[f"w{i}"] = (w * s[None, :]).astype(compute_dtype)
        p[f"t{i}"] = (b * s + t).reshape(1, H).astype(jnp.float32)

    # Pack the five heads: W1 concat (H, 5*H2), W2/W3 block-diagonal, lane-dense W3/B3.
    head_names = ["home_goal_fc", "away_goal_fc", "home_shots_fc", "away_shots_fc", "outcome_fc"]
    out_dims = [1, 1, 1, 1, 3]
    col_off = np.cumsum([0] + out_dims[:-1])

    W1 = np.zeros((H, 5 * H2), np.float32)
    T1 = np.zeros((5 * H2,), np.float32)
    W2 = np.zeros((5 * H2, 5 * H4), np.float32)
    T2 = np.zeros((5 * H4,), np.float32)
    W3 = np.zeros((5 * H4, OUT_W), np.float32)
    B3 = np.zeros((OUT_W,), np.float32)

    for k, name in enumerate(head_names):
        hp = raw[name]
        w1, b1 = hp["lin1"]
        s1, t1 = bn_fold(*hp["bn1"])
        W1[:, k * H2:(k + 1) * H2] = np.asarray(w1 * s1[None, :])
        T1[k * H2:(k + 1) * H2] = np.asarray(b1 * s1 + t1)

        w2, b2 = hp["lin2"]
        if "bn2" in hp:                      # outcome head has BN after second linear
            s2, t2 = bn_fold(*hp["bn2"])
        else:                                # goal/shot heads: identity
            s2 = jnp.ones((H4,), jnp.float32)
            t2 = jnp.zeros((H4,), jnp.float32)
        W2[k * H2:(k + 1) * H2, k * H4:(k + 1) * H4] = np.asarray(w2 * s2[None, :])
        T2[k * H4:(k + 1) * H4] = np.asarray(b2 * s2 + t2)

        w3, b3 = hp["lin3"]
        c0, d = int(col_off[k]), out_dims[k]
        W3[k * H4:(k + 1) * H4, c0:c0 + d] = np.asarray(w3)
        B3[c0:c0 + d] = np.asarray(b3)

    p["hw1"] = jnp.asarray(W1, compute_dtype)
    p["ht1"] = jnp.asarray(T1.reshape(1, -1), jnp.float32)
    p["hw2"] = jnp.asarray(W2, compute_dtype)
    p["ht2"] = jnp.asarray(T2.reshape(1, -1), jnp.float32)
    p["hw3"] = jnp.asarray(W3, compute_dtype)
    p["hb3"] = jnp.asarray(B3.reshape(1, -1), jnp.float32)
    return p


# ----------------------------------------------------------------------------- raw param init (matches PyTorch module layout)
def init_bn_raw(key, c):
    k1, k2, k3, k4 = jax.random.split(key, 4)
    gamma = 1.0 + 0.1 * jax.random.normal(k1, (c,), jnp.float32)
    beta = 0.1 * jax.random.normal(k2, (c,), jnp.float32)
    mean = 0.1 * jax.random.normal(k3, (c,), jnp.float32)
    var = 0.9 + 0.2 * jax.random.uniform(k4, (c,), jnp.float32)
    return (gamma, beta, mean, var)


def init_linear_raw(key, fan_in, fan_out):
    k1, k2 = jax.random.split(key)
    w = jax.random.normal(k1, (fan_in, fan_out), jnp.float32) / jnp.sqrt(float(fan_in))
    b = 0.05 * jax.random.normal(k2, (fan_out,), jnp.float32)
    return (w, b)


def init_raw_params(key, in_channels, hidden):
    H, H2, H4 = hidden, hidden // 2, hidden // 4
    keys = jax.random.split(key, 16)
    raw = {}
    raw["input_feature_bn"] = init_bn_raw(keys[0], in_channels)
    raw["input_linear"] = init_linear_raw(keys[1], in_channels, H)
    raw["input_bn"] = init_bn_raw(keys[2], H)
    for i, k in zip((1, 2, 3), (3, 4, 5)):
        kw, kb = jax.random.split(keys[k])
        raw[f"conv{i}"] = init_linear_raw(kw, H, H)
        raw[f"bn{i}"] = init_bn_raw(kb, H)

    def make_head(k, out_dim, with_bn2):
        kk = jax.random.split(k, 6)
        hp = {
            "lin1": init_linear_raw(kk[0], H, H2),
            "bn1": init_bn_raw(kk[1], H2),
            "lin2": init_linear_raw(kk[2], H2, H4),
            "lin3": init_linear_raw(kk[4], H4, out_dim),
        }
        if with_bn2:
            hp["bn2"] = init_bn_raw(kk[3], H4)
        return hp

    raw["home_goal_fc"] = make_head(keys[6], 1, False)
    raw["away_goal_fc"] = make_head(keys[7], 1, False)
    raw["home_shots_fc"] = make_head(keys[8], 1, False)
    raw["away_shots_fc"] = make_head(keys[9], 1, False)
    raw["outcome_fc"] = make_head(keys[10], 3, True)
    return raw


# ----------------------------------------------------------------------------- reference (pure JAX, original module semantics)
def reference_forward(raw, x, edge_index, game_indices):
    a_hat = build_gcn_adj(edge_index, x.shape[0])

    def bn(v, prm):
        gamma, beta, mean, var = prm
        return (v - mean) * jax.lax.rsqrt(var + EPS) * gamma + beta

    x = bn(x, raw["input_feature_bn"])
    w, b = raw["input_linear"]
    h = jnp.maximum(bn(x @ w + b, raw["input_bn"]), 0.0)
    for i in (1, 2, 3):
        w, b = raw[f"conv{i}"]
        hi = jnp.maximum(bn(a_hat @ (h @ w) + b, raw[f"bn{i}"]), 0.0)
        h = h + hi
    xg = h[game_indices]

    def head(hp):
        w1, b1 = hp["lin1"]
        z = jnp.maximum(bn(xg @ w1 + b1, hp["bn1"]), 0.0)
        w2, b2 = hp["lin2"]
        z = z @ w2 + b2
        if "bn2" in hp:
            z = bn(z, hp["bn2"])
        z = jnp.maximum(z, 0.0)
        w3, b3 = hp["lin3"]
        return z @ w3 + b3

    return {
        "home_goals": head(raw["home_goal_fc"]),
        "away_goals": head(raw["away_goal_fc"]),
        "home_shot_attempts": head(raw["home_shots_fc"]),
        "away_shot_attempts": head(raw["away_shots_fc"]),
        "outcome_logits": head(raw["outcome_fc"]),
    }


# ----------------------------------------------------------------------------- main
if __name__ == "__main__":
    IN_CHANNELS = 12
    HIDDEN = 32
    NUM_NODES = 16
    NUM_GAMES = 4

    key = jax.random.PRNGKey(0)
    k_param, k_x = jax.random.split(key)
    raw_params = init_raw_params(k_param, IN_CHANNELS, HIDDEN)
    fused_params = prepare_fused_params(raw_params, HIDDEN, compute_dtype=jnp.float32)

    # Node features
    x = jax.random.normal(k_x, (NUM_NODES, IN_CHANNELS), jnp.float32)

    # Undirected graph: game node g (0..3) connects to team nodes 4+3g, 5+3g, 6+3g.
    src, dst = [], []
    for g in range(NUM_GAMES):
        for t in range(3):
            a, b = g, 4 + 3 * g + t
            src += [a, b]
            dst += [b, a]
    edge_index = jnp.array([src, dst], dtype=jnp.int32)
    game_indices = jnp.arange(NUM_GAMES, dtype=jnp.int32)

    # Precompute the static-graph operators ONCE (not per forward call).
    a_hat = build_gcn_adj(edge_index, NUM_NODES)
    sel = build_game_selector(game_indices, NUM_NODES)

    out = multi_headed_hockey_gnn_forward(fused_params, x, a_hat, sel)
    out = jax.block_until_ready(out)

    ref = reference_forward(raw_params, x, edge_index, game_indices)
    for name in OUT_COLS:
        np.testing.assert_allclose(np.asarray(out[name]), np.asarray(ref[name]),
                                   rtol=2e-2, atol=2e-3)
        assert out[name].shape == (NUM_GAMES, 3 if name == "outcome_logits" else 1)

    print("KERNEL_OK")
</pallas_src>

<mosaic_0001>
module attributes {stable_mosaic.version = 11 : i64} {
  func.func @fused_gnn_kernel(%arg0: memref<16x12xf32, #tpu.memory_space<vmem>>, %arg1: memref<16x16xf32, #tpu.memory_space<vmem>>, %arg2: memref<4x16xf32, #tpu.memory_space<vmem>>, %arg3: memref<12x32xf32, #tpu.memory_space<vmem>>, %arg4: memref<1x32xf32, #tpu.memory_space<vmem>>, %arg5: memref<32x32xf32, #tpu.memory_space<vmem>>, %arg6: memref<1x32xf32, #tpu.memory_space<vmem>>, %arg7: memref<32x32xf32, #tpu.memory_space<vmem>>, %arg8: memref<1x32xf32, #tpu.memory_space<vmem>>, %arg9: memref<32x32xf32, #tpu.memory_space<vmem>>, %arg10: memref<1x32xf32, #tpu.memory_space<vmem>>, %arg11: memref<32x80xf32, #tpu.memory_space<vmem>>, %arg12: memref<1x80xf32, #tpu.memory_space<vmem>>, %arg13: memref<80x40xf32, #tpu.memory_space<vmem>>, %arg14: memref<1x40xf32, #tpu.memory_space<vmem>>, %arg15: memref<40x128xf32, #tpu.memory_space<vmem>>, %arg16: memref<1x128xf32, #tpu.memory_space<vmem>>, %arg17: memref<4x128xf32, #tpu.memory_space<vmem>>) attributes {dimension_semantics = [], scalar_prefetch = 0 : i64, scratch_operands = 0 : i64, tpu.core_type = #tpu.core_type<tc>} {
    %c0 = arith.constant 0 : index
    %c0_0 = arith.constant 0 : index
    %0 = vector.load %arg1[%c0, %c0_0] : memref<16x16xf32, #tpu.memory_space<vmem>>, vector<16x16xf32>
    %c0_1 = arith.constant 0 : index
    %c0_2 = arith.constant 0 : index
    %1 = vector.load %arg0[%c0_1, %c0_2] : memref<16x12xf32, #tpu.memory_space<vmem>>, vector<16x12xf32>
    %c0_3 = arith.constant 0 : index
    %c0_4 = arith.constant 0 : index
    %2 = vector.load %arg3[%c0_3, %c0_4] : memref<12x32xf32, #tpu.memory_space<vmem>>, vector<12x32xf32>
    %cst = arith.constant dense<0.000000e+00> : vector<16x32xf32>
    %3 = tpu.matmul %1, %2, %cst {dimension_numbers = #tpu.dot_dimension_numbers<[1], [0], [0], [1], [0, 0, 1, 1], [], []>} : vector<16x12xf32>, vector<12x32xf32>, vector<16x32xf32> -> vector<16x32xf32>
    %c0_5 = arith.constant 0 : index
    %c0_6 = arith.constant 0 : index
    %4 = vector.load %arg4[%c0_5, %c0_6] : memref<1x32xf32, #tpu.memory_space<vmem>>, vector<1x32xf32>
    %5 = vector.broadcast %4 : vector<1x32xf32> to vector<16x32xf32>
    %6 = arith.addf %3, %5 : vector<16x32xf32>
    %cst_7 = arith.constant 0.000000e+00 : f32
    %7 = vector.broadcast %cst_7 : f32 to vector<16x32xf32>
    %8 = arith.maximumf %6, %7 : vector<16x32xf32>
    %c0_8 = arith.constant 0 : index
    %c0_9 = arith.constant 0 : index
    %9 = vector.load %arg5[%c0_8, %c0_9] : memref<32x32xf32, #tpu.memory_space<vmem>>, vector<32x32xf32>
    %cst_10 = arith.constant dense<0.000000e+00> : vector<16x32xf32>
    %10 = tpu.matmul %8, %9, %cst_10 {dimension_numbers = #tpu.dot_dimension_numbers<[1], [0], [0], [1], [0, 0, 1, 1], [], []>} : vector<16x32xf32>, vector<32x32xf32>, vector<16x32xf32> -> vector<16x32xf32>
    %cst_11 = arith.constant dense<0.000000e+00> : vector<16x32xf32>
    %11 = tpu.matmul %0, %10, %cst_11 {dimension_numbers = #tpu.dot_dimension_numbers<[1], [0], [0], [1], [0, 0, 1, 1], [], []>} : vector<16x16xf32>, vector<16x32xf32>, vector<16x32xf32> -> vector<16x32xf32>
    %c0_12 = arith.constant 0 : index
    %c0_13 = arith.constant 0 : index
    %12 = vector.load %arg6[%c0_12, %c0_13] : memref<1x32xf32, #tpu.memory_space<vmem>>, vector<1x32xf32>
    %13 = vector.broadcast %12 : vector<1x32xf32> to vector<16x32xf32>
    %14 = arith.addf %11, %13 : vector<16x32xf32>
    %cst_14 = arith.constant 0.000000e+00 : f32
    %15 = vector.broadcast %cst_14 : f32 to vector<16x32xf32>
    %16 = arith.maximumf %14, %15 : vector<16x32xf32>
    %17 = arith.addf %8, %16 : vector<16x32xf32>
    %c0_15 = arith.constant 0 : index
    %c0_16 = arith.constant 0 : index
    %18 = vector.load %arg7[%c0_15, %c0_16] : memref<32x32xf32, #tpu.memory_space<vmem>>, vector<32x32xf32>
    %cst_17 = arith.constant dense<0.000000e+00> : vector<16x32xf32>
    %19 = tpu.matmul %17, %18, %cst_17 {dimension_numbers = #tpu.dot_dimension_numbers<[1], [0], [0], [1], [0, 0, 1, 1], [], []>} : vector<16x32xf32>, vector<32x32xf32>, vector<16x32xf32> -> vector<16x32xf32>
    %cst_18 = arith.constant dense<0.000000e+00> : vector<16x32xf32>
    %20 = tpu.matmul %0, %19, %cst_18 {dimension_numbers = #tpu.dot_dimension_numbers<[1], [0], [0], [1], [0, 0, 1, 1], [], []>} : vector<16x16xf32>, vector<16x32xf32>, vector<16x32xf32> -> vector<16x32xf32>
    %c0_19 = arith.constant 0 : index
    %c0_20 = arith.constant 0 : index
    %21 = vector.load %arg8[%c0_19, %c0_20] : memref<1x32xf32, #tpu.memory_space<vmem>>, vector<1x32xf32>
    %22 = vector.broadcast %21 : vector<1x32xf32> to vector<16x32xf32>
    %23 = arith.addf %20, %22 : vector<16x32xf32>
    %cst_21 = arith.constant 0.000000e+00 : f32
    %24 = vector.broadcast %cst_21 : f32 to vector<16x32xf32>
    %25 = arith.maximumf %23, %24 : vector<16x32xf32>
    %26 = arith.addf %17, %25 : vector<16x32xf32>
    %c0_22 = arith.constant 0 : index
    %c0_23 = arith.constant 0 : index
    %27 = vector.load %arg9[%c0_22, %c0_23] : memref<32x32xf32, #tpu.memory_space<vmem>>, vector<32x32xf32>
    %cst_24 = arith.constant dense<0.000000e+00> : vector<16x32xf32>
    %28 = tpu.matmul %26, %27, %cst_24 {dimension_numbers = #tpu.dot_dimension_numbers<[1], [0], [0], [1], [0, 0, 1, 1], [], []>} : vector<16x32xf32>, vector<32x32xf32>, vector<16x32xf32> -> vector<16x32xf32>
    %cst_25 = arith.constant dense<0.000000e+00> : vector<16x32xf32>
    %29 = tpu.matmul %0, %28, %cst_25 {dimension_numbers = #tpu.dot_dimension_numbers<[1], [0], [0], [1], [0, 0, 1, 1], [], []>} : vector<16x16xf32>, vector<16x32xf32>, vector<16x32xf32> -> vector<16x32xf32>
    %c0_26 = arith.constant 0 : index
    %c0_27 = arith.constant 0 : index
    %30 = vector.load %arg10[%c0_26, %c0_27] : memref<1x32xf32, #tpu.memory_space<vmem>>, vector<1x32xf32>
    %31 = vector.broadcast %30 : vector<1x32xf32> to vector<16x32xf32>
    %32 = arith.addf %29, %31 : vector<16x32xf32>
    %cst_28 = arith.constant 0.000000e+00 : f32
    %33 = vector.broadcast %cst_28 : f32 to vector<16x32xf32>
    %34 = arith.maximumf %32, %33 : vector<16x32xf32>
    %35 = arith.addf %26, %34 : vector<16x32xf32>
    %c0_29 = arith.constant 0 : index
    %c0_30 = arith.constant 0 : index
    %36 = vector.load %arg2[%c0_29, %c0_30] : memref<4x16xf32, #tpu.memory_space<vmem>>, vector<4x16xf32>
    %cst_31 = arith.constant dense<0.000000e+00> : vector<4x32xf32>
    %37 = tpu.matmul %36, %35, %cst_31 {dimension_numbers = #tpu.dot_dimension_numbers<[1], [0], [0], [1], [0, 0, 1, 1], [], []>} : vector<4x16xf32>, vector<16x32xf32>, vector<4x32xf32> -> vector<4x32xf32>
    %c0_32 = arith.constant 0 : index
    %c0_33 = arith.constant 0 : index
    %38 = vector.load %arg11[%c0_32, %c0_33] : memref<32x80xf32, #tpu.memory_space<vmem>>, vector<32x80xf32>
    %cst_34 = arith.constant dense<0.000000e+00> : vector<4x80xf32>
    %39 = tpu.matmul %37, %38, %cst_34 {dimension_numbers = #tpu.dot_dimension_numbers<[1], [0], [0], [1], [0, 0, 1, 1], [], []>} : vector<4x32xf32>, vector<32x80xf32>, vector<4x80xf32> -> vector<4x80xf32>
    %c0_35 = arith.constant 0 : index
    %c0_36 = arith.constant 0 : index
    %40 = vector.load %arg12[%c0_35, %c0_36] : memref<1x80xf32, #tpu.memory_space<vmem>>, vector<1x80xf32>
    %41 = vector.broadcast %40 : vector<1x80xf32> to vector<4x80xf32>
    %42 = arith.addf %39, %41 : vector<4x80xf32>
    %cst_37 = arith.constant 0.000000e+00 : f32
    %43 = vector.broadcast %cst_37 : f32 to vector<4x80xf32>
    %44 = arith.maximumf %42, %43 : vector<4x80xf32>
    %c0_38 = arith.constant 0 : index
    %c0_39 = arith.constant 0 : index
    %45 = vector.load %arg13[%c0_38, %c0_39] : memref<80x40xf32, #tpu.memory_space<vmem>>, vector<80x40xf32>
    %cst_40 = arith.constant dense<0.000000e+00> : vector<4x40xf32>
    %46 = tpu.matmul %44, %45, %cst_40 {dimension_numbers = #tpu.dot_dimension_numbers<[1], [0], [0], [1], [0, 0, 1, 1], [], []>} : vector<4x80xf32>, vector<80x40xf32>, vector<4x40xf32> -> vector<4x40xf32>
    %c0_41 = arith.constant 0 : index
    %c0_42 = arith.constant 0 : index
    %47 = vector.load %arg14[%c0_41, %c0_42] : memref<1x40xf32, #tpu.memory_space<vmem>>, vector<1x40xf32>
    %48 = vector.broadcast %47 : vector<1x40xf32> to vector<4x40xf32>
    %49 = arith.addf %46, %48 : vector<4x40xf32>
    %cst_43 = arith.constant 0.000000e+00 : f32
    %50 = vector.broadcast %cst_43 : f32 to vector<4x40xf32>
    %51 = arith.maximumf %49, %50 : vector<4x40xf32>
    %c0_44 = arith.constant 0 : index
    %c0_45 = arith.constant 0 : index
    %52 = vector.load %arg15[%c0_44, %c0_45] : memref<40x128xf32, #tpu.memory_space<vmem>>, vector<40x128xf32>
    %cst_46 = arith.constant dense<0.000000e+00> : vector<4x128xf32>
    %53 = tpu.matmul %51, %52, %cst_46 {dimension_numbers = #tpu.dot_dimension_numbers<[1], [0], [0], [1], [0, 0, 1, 1], [], []>} : vector<4x40xf32>, vector<40x128xf32>, vector<4x128xf32> -> vector<4x128xf32>
    %c0_47 = arith.constant 0 : index
    %c0_48 = arith.constant 0 : index
    %54 = vector.load %arg16[%c0_47, %c0_48] : memref<1x128xf32, #tpu.memory_space<vmem>>, vector<1x128xf32>
    %55 = vector.broadcast %54 : vector<1x128xf32> to vector<4x128xf32>
    %56 = arith.addf %53, %55 : vector<4x128xf32>
    %c0_49 = arith.constant 0 : index
    %c0_50 = arith.constant 0 : index
    %57 = vector.load %arg17[%c0_49, %c0_50] : memref<4x128xf32, #tpu.memory_space<vmem>>, vector<4x128xf32>
    tpu.vector_store %arg17[%c0_49, %c0_50], %56 {strides = array<i32>} : memref<4x128xf32, #tpu.memory_space<vmem>>, vector<4x128xf32>,
    return
  }
}

</mosaic_0001>

<bundles_post_ra>
// kernel: tpu_custom_call.1
= control target key start
LH: loop header
LB: loop body
LE: loop exit
PB: predicated region body
PF: predicated region fallthrough
CT: control target
= control target key end

     0   :  { %s941_s0 = inlined_call_operand.vmem [shape: f32[16,12], index: 0, kind: input, shape index: {}]   ;;  %s942_s1 = inlined_call_operand.hbm [shape: f32[16,16], index: 1, kind: input, shape index: {}]   ;;  %s943_s2 = inlined_call_operand.hbm [shape: f32[4,16], index: 2, kind: input, shape index: {}]   ;;  %s944_s3 = inlined_call_operand.hbm [shape: f32[12,32], index: 3, kind: input, shape index: {}]   ;;  %s945_s4 = inlined_call_operand.vmem [shape: f32[1,32], index: 4, kind: input, shape index: {}]   ;;  %s946_s5 = inlined_call_operand.vmem [shape: f32[32,32], index: 5, kind: input, shape index: {}]   ;;  %s947_s6 = inlined_call_operand.vmem [shape: f32[1,32], index: 6, kind: input, shape index: {}]   ;;  %s948_s7 = inlined_call_operand.vmem [shape: f32[32,32], index: 7, kind: input, shape index: {}]   ;;  %s949_s8 = inlined_call_operand.vmem [shape: f32[1,32], index: 8, kind: input, shape index: {}]   ;;  %s950_s9 = inlined_call_operand.hbm [shape: f32[32,32], index: 9, kind: input, shape index: {}]   ;;  %s951_s10 = inlined_call_operand.vmem [shape: f32[1,32], index: 10, kind: input, shape index: {}]   ;;  %s952_s11 = inlined_call_operand.hbm [shape: f32[32,80], index: 11, kind: input, shape index: {}]   ;;  %s953_s12 = inlined_call_operand.vmem [shape: f32[1,80], index: 12, kind: input, shape index: {}]   ;;  %s954_s13 = inlined_call_operand.vmem [shape: f32[80,40], index: 13, kind: input, shape index: {}]   ;;  %s955_s14 = inlined_call_operand.vmem [shape: f32[1,40], index: 14, kind: input, shape index: {}]   ;;  %s956_s15 = inlined_call_operand.vmem [shape: f32[40,128], index: 15, kind: input, shape index: {}]   ;;  %s957_s16 = inlined_call_operand.vmem [shape: f32[1,128], index: 16, kind: input, shape index: {}]   ;;  %s958_s17 = inlined_call_operand.hbm [shape: f32[4,128], index: 17, kind: output, shape index: {}]  }
   0x1   :  { %960 = sst [smem:[#allocation16_spill]] %s941_s0 }
   0x2   :  { %961 = sst [smem:[#allocation17_spill]] %s942_s1 }
   0x3   :  { %22 = vsyncpa [#allocation3], 0 }
   0x4   :  { %23 = vsyncpa [#allocation6], 0 }
   0x5   :  { %24 = vsyncpa [#allocation9], 0  ;;  %s46_s26 = sshll.u32 %s943_s2, 4  ;;  %s47_s26 = int_to_ptr.hbm [resolvable:$true] %s46_s26 }
   0x6   :  { %25 = vsyncpa [#allocation4], 0  ;;  %s715_s27 = smov [#allocation5]   ;;  %s79_s30 = sshll.u32 %s950_s9, 4  ;;  %s80_s30 = int_to_ptr.hbm [resolvable:$true] %s79_s30 }
   0x7   :  { %s48_s28 = sshll.u32 %s715_s27, 4  ;;  %s716_s18 = smov [#allocation8]   ;;  %s49_s28 = int_to_ptr.vmem [resolvable:$true] %s48_s28 }
   0x8   :  { %51 = dma.hbm_to_vmem [thread:$0]  %s47_s26, 64, %s49_s28, [#allocation6]  }
   0x9   :  { %s81_s19 = sshll.u32 %s716_s18, 4  ;;  %s962_s21 = sld [smem:[#allocation17_spill]]  ;;  %s82_s19 = int_to_ptr.vmem [resolvable:$true] %s81_s19 }
   0xa   :  { %s717_s2 = smov 128   ;;  %s718_s23 = smov 8  }
   0xb   :  { %87 = dma.hbm_to_vmem [thread:$0]  %s80_s30, 512, %s82_s19, [#allocation9], %s717_s2, %s717_s2, %s718_s23  }
   0xc   :  { %s56_s26 = sshll.u32 %s944_s3, 4  ;;  %s719_s27 = smov [#allocation2]   ;;  %s57_s26 = int_to_ptr.hbm [resolvable:$true] %s56_s26 }
   0xd   :  { %s34_s28 = sshll.u32 %s719_s27, 4  ;;  %s720_s9 = smov [#allocation7]   ;;  %s35_s28 = int_to_ptr.vmem [resolvable:$true] %s34_s28 }
   0xe   :  { %s58_s29 = sshll.u32 %s720_s9, 4  ;;  %s94_s1 = sshll.u32 %s952_s11, 4  ;;  %s59_s29 = int_to_ptr.vmem [resolvable:$true] %s58_s29  ;;  %s95_s1 = int_to_ptr.hbm [resolvable:$true] %s94_s1 }
   0xf   :  { %s32_s22 = sshll.u32 %s962_s21, 4  ;;  %s721_s20 = smov [#allocation10]   ;;  %s33_s22 = int_to_ptr.hbm [resolvable:$true] %s32_s22 }
  0x10   :  { %40 = dma.hbm_to_vmem [thread:$0]  %s33_s22, 256, %s35_s28, [#allocation3], %s717_s2, %s717_s2, %s718_s23  }
  0x11   :  { %64 = dma.hbm_to_vmem [thread:$0]  %s57_s26, 256, %s59_s29, [#allocation6], %s717_s2, %s717_s2, %s718_s23  }
  0x12   :  { %s96_s30 = sshll.u32 %s721_s20, 4  ;;  %s97_s30 = int_to_ptr.vmem [resolvable:$true] %s96_s30 }
  0x13   :  { %102 = dma.hbm_to_vmem [thread:$0]  %s95_s1, 512, %s97_s30, [#allocation9], %s717_s2, %s717_s2, %s718_s23  }
  0x14   :  { %707 = dma.done.wait [#allocation3], 256  }
  0x15   :  { %708 = vsyncadd [#allocation3], 4294967040 }
  0x16   :  { %709 = dma.done.wait [#allocation6], 320  }
  0x17   :  { %710 = vsyncadd [#allocation6], 4294966976 }
  0x18   :  { %711 = dma.done.wait [#allocation9], 1024  }
  0x19   :  { %712 = vsyncadd [#allocation9], 4294966272  ;;  %vm150_vm0 = vcmask 1043456   ;;  %v138_v0 = vld [vmem:[#allocation7 + $0x8] sm:$0xf]  ;;  %v137_v1 = vld [vmem:[#allocation7] sm:$0xff] }
  0x1a   :  { %527 = vmatpush.msk.msra.mxu0 %vm150_vm0, %v138_v0  ;;  %s963_s11 = sld [smem:[#allocation16_spill]]  ;;  %vm143_vm1 = vcmask 97280   ;;  %546 = vmatpush.msk.msra.mxu1 %vm150_vm0, %v138_v0  ;;  %v182_v4 = vld [vmem:[%s946_s5 + $0x18] sm:$0xff]  ;;  %v181_v5 = vld [vmem:[%s946_s5 + $0x10] sm:$0xff]  ;;  %v180_v6 = vld [vmem:[%s946_s5 + $0x8] sm:$0xff]  ;;  %vm183_vm2 = vcmask 261120  }
  0x1b   :  { %v179_v7 = vld [vmem:[%s946_s5] sm:$0xff]  ;;  %vm217_vm3 = vcmask 130048   ;;  %v134_v18 = vld [vmem:[#allocation2 + $0x8] sm:$0xff]  ;;  %v254_v19 = vld [vmem:[%s948_s7 + $0x18] sm:$0xff]  ;;  %vm449_vm4 = vcmask 654336   ;;  %vm483_vm5 = vcmask 326656  }
  0x1c   :  { %169 = vmatpush.msra.mxu0 %v137_v1  ;;  %547 = vmatpush.msra.mxu1 %v137_v1  ;;  %v556_v8 = vld [vmem:[%s945_s4] ss:$0 sm:$0xff]  ;;  %v253_v20 = vld [vmem:[%s948_s7 + $0x10] sm:$0xff]  ;;  %v252_v21 = vld [vmem:[%s948_s7 + $0x8] sm:$0xff]  ;;  %s722_s29 = smov [#allocation11]  }
  0x1d   :  { %v133_v17 = vld [vmem:[#allocation2] sm:$0xff]  ;;  %273 = vmatpush.msra.mxu3 %v254_v19  ;;  %v317_v35 = vld [vmem:[#allocation8 + $0x10] sm:$0xff]  ;;  %v316_v36 = vld [vmem:[#allocation8 + $0x8] sm:$0xff]  ;;  %s513_s0 = sshll.u32 %s722_s29, 4  ;;  %s514_s0 = int_to_ptr.vmem [resolvable:$true] %s513_s0 }
  0x1e   :  { %202 = vmatpush.msrb.mxu1 %v182_v4  ;;  %v251_v22 = vld [vmem:[%s948_s7] sm:$0xff]  ;;  %v379_v58 = vld [vmem:[#allocation5] sm:$0xf]  ;;  %v405_v60 = vld [vmem:[#allocation10 + $0x10] sm:$0xff] }
  0x1f   :  { %274 = vmatpush.msra.mxu3 %v253_v20  ;;  %v557_v23 = vld [vmem:[%s947_s6] ss:$0 sm:$0xff]  ;;  %v315_v37 = vld [vmem:[#allocation8] sm:$0xff]  ;;  %v404_v61 = vld [vmem:[#allocation10 + $0x8] sm:$0xff] }
  0x20   :  { %v135_v2 = vld [vmem:[%s963_s11] sm:$0xff]  ;;  %v136_v3 = vld [vmem:[%s963_s11 + $0x8] sm:$0xff]  ;;  %203 = vmatpush.msrb.mxu1 %v181_v5  ;;  %v442_v1 = vld [vmem:[%s954_s13 + $0x38] sm:$0xff] }
  0x21   :  { %528 = vmatmul.msk.f32.vlgmr.msra.gmra.mxu0 %vm143_vm1, %v135_v2  ;;  %529 = vmatmul.msk.f32.vlgmr.msra.gmra.mxu1 %vm143_vm1, %v136_v3  ;;  %v318_v34 = vld [vmem:[#allocation8 + $0x18] sm:$0xff]  ;;  %v403_v62 = vld [vmem:[#allocation10] sm:$0xff]  ;;  %v441_v2 = vld [vmem:[%s954_s13 + $0x30] sm:$0xff] }
  0x22   :  { %204 = vmatpush.msrb.mxu1 %v180_v6  ;;  %275 = vmatpush.msra.mxu3 %v252_v21  ;;  %v558_v38 = vld [vmem:[%s949_s8] ss:$0 sm:$0xff]  ;;  %v444_v63 = vld [vmem:[%s954_s13 + $0x48] sm:$0xff]  ;;  %v438_v5 = vld [vmem:[%s954_s13 + $0x18] sm:$0xff] }
  0x23   :  { %v559_v50 = vld [vmem:[%s951_s10] ss:$0 sm:$0xff]  ;;  %v440_v3 = vld [vmem:[%s954_s13 + $0x28] sm:$0xff] }
  0x24   :  { %205 = vmatpush.msrb.mxu1 %v179_v7  ;;  %276 = vmatpush.msra.mxu3 %v251_v22  ;;  %v406_v59 = vld [vmem:[#allocation10 + $0x18] sm:$0xff]  ;;  %v437_v7 = vld [vmem:[%s954_s13 + $0x10] sm:$0xff] }
  0x25   :  { %v443_v0 = vld [vmem:[%s954_s13 + $0x40] sm:$0xff] }
  0x26   :  { %v439_v4 = vld [vmem:[%s954_s13 + $0x20] sm:$0xff] }
  0x27   :  { %v561_v19 = vld [vmem:[%s955_s14] ss:$0 sm:$0xff] }
  0x9e   :  { %v171_v9 = vpop.f32.mrf.mxu0  ;;  %v174_v11 = vpop.f32.mrf.mxu1 }
  0x9f   :  { %v172_v10 = vadd.f32 %v556_v8, %v171_v9  ;;  %v175_v13 = vadd.f32 %v556_v8, %v174_v11  ;;  %v436_v8 = vld [vmem:[%s954_s13 + $0x8] sm:$0xff]  ;;  %v435_v9 = vld [vmem:[%s954_s13] sm:$0xff]  ;;  %v477_v11 = vld [vmem:[%s956_s15 + $0x18] sm:$0xff] }
  0xa1   :  { %v177_v12 = vmax.f32 %v172_v10, 0.0  ;;  %v178_v14 = vmax.f32 %v175_v13, 0.0  ;;  %v478_v10 = vld [vmem:[%s956_s15 + $0x20] sm:$0xff]  ;;  %v475_v13 = vld [vmem:[%s956_s15 + $0x8] sm:$0xff] }
  0xa3   :  { %530 = vmatmul.msk.f32.vlgmr.msrb.gmra.mxu1 %vm183_vm2, %v177_v12 }
  0xab   :  { %531 = vmatmul.msk.f32.gmra.mxu1 %vm183_vm2, %v178_v14 }
 0x120   :  { %v207_v15 = vpop.f32.mrf.mxu1 }
 0x128   :  { %v210_v16 = vpop.f32.mrf.mxu1 }
 0x129   :  { %238 = vmatpush.msra.mxu2 %v210_v16 }
 0x12b   :  { %239 = vmatpush.msra.mxu2 %v207_v15 }
 0x12c   :  { %532 = vmatmul.msk.f32.vlgmr.msra.gmra.mxu2 %vm217_vm3, %v133_v17 }
 0x12d   :  { %337 = vmatpush.msrb.mxu2 %v318_v34 }
 0x12f   :  { %338 = vmatpush.msrb.mxu2 %v317_v35 }
 0x131   :  { %339 = vmatpush.msrb.mxu2 %v316_v36 }
 0x133   :  { %340 = vmatpush.msrb.mxu2 %v315_v37 }
 0x134   :  { %533 = vmatmul.msk.f32.gmra.mxu2 %vm217_vm3, %v134_v18 }
 0x135   :  { %498 = vmatpush.msra.mxu2 %v478_v10 }
 0x137   :  { %499 = vmatpush.msra.mxu2 %v477_v11 }
 0x1af   :  { %v241_v24 = vpop.f32.mrf.mxu2 }
 0x1b0   :  { %v242_v25 = vadd.f32 %v557_v23, %v241_v24 }
 0x1b2   :  { %v247_v26 = vmax.f32 %v242_v25, 0.0 }
 0x1b4   :  { %v249_v27 = vadd.f32 %v247_v26, %v177_v12  ;;  %v476_v12 = vld [vmem:[%s956_s15 + $0x10] sm:$0xff] }
 0x1b5   :  { %500 = vmatpush.msra.mxu2 %v476_v12 }
 0x1b6   :  { %534 = vmatmul.msk.f32.vlgmr.msra.gmra.mxu3 %vm183_vm2, %v249_v27 }
 0x1b7   :  { %v244_v28 = vpop.f32.mrf.mxu2  ;;  %501 = vmatpush.msra.mxu2 %v475_v13 }
 0x1b8   :  { %v245_v29 = vadd.f32 %v557_v23, %v244_v28  ;;  %v562_v23 = vld [vmem:[%s957_s16] ss:$0 sm:$0xff] }
 0x1ba   :  { %v248_v30 = vmax.f32 %v245_v29, 0.0 }
 0x1bc   :  { %v250_v31 = vadd.f32 %v248_v30, %v178_v14  ;;  %v560_v14 = vld [vmem:[%s953_s12] ss:$0 sm:$0xff] }
 0x1be   :  { %535 = vmatmul.msk.f32.gmra.mxu3 %vm183_vm2, %v250_v31 }
 0x239   :  { %v278_v32 = vpop.f32.mrf.mxu3 }
 0x241   :  { %v281_v33 = vpop.f32.mrf.mxu3 }
 0x242   :  { %302 = vmatpush.msrb.mxu0 %v281_v33 }
 0x244   :  { %303 = vmatpush.msrb.mxu0 %v278_v32 }
 0x245   :  { %536 = vmatmul.msk.f32.vlgmr.msrb.gmra.mxu0 %vm217_vm3, %v133_v17 }
 0x246   :  { %459 = vmatpush.msra.mxu0 %v444_v63 }
 0x248   :  { %460 = vmatpush.msra.mxu0 %v443_v0 }
 0x24a   :  { %461 = vmatpush.msra.mxu0 %v442_v1 }
 0x24c   :  { %462 = vmatpush.msra.mxu0 %v441_v2 }
 0x24d   :  { %537 = vmatmul.msk.f32.gmra.mxu0 %vm217_vm3, %v134_v18 }
 0x24e   :  { %463 = vmatpush.msra.mxu0 %v440_v3 }
 0x250   :  { %464 = vmatpush.msra.mxu0 %v439_v4 }
 0x252   :  { %465 = vmatpush.msra.mxu0 %v438_v5 }
 0x254   :  { %466 = vmatpush.msra.mxu0 %v437_v7 }
 0x256   :  { %467 = vmatpush.msra.mxu0 %v436_v8 }
 0x258   :  { %468 = vmatpush.msra.mxu0 %v435_v9 }
 0x2c2   :  { %v305_v39 = vpop.f32.mrf.mxu0 }
 0x2c3   :  { %v306_v40 = vadd.f32 %v558_v38, %v305_v39 }
 0x2c5   :  { %v311_v41 = vmax.f32 %v306_v40, 0.0 }
 0x2c7   :  { %v313_v42 = vadd.f32 %v311_v41, %v249_v27 }
 0x2c9   :  { %538 = vmatmul.msk.f32.vlgmr.msrb.gmra.mxu2 %vm183_vm2, %v313_v42 }
 0x2ca   :  { %v308_v43 = vpop.f32.mrf.mxu0 }
 0x2cb   :  { %v309_v44 = vadd.f32 %v558_v38, %v308_v43 }
 0x2cd   :  { %v312_v45 = vmax.f32 %v309_v44, 0.0 }
 0x2cf   :  { %v314_v46 = vadd.f32 %v312_v45, %v250_v31 }
 0x2d1   :  { %539 = vmatmul.msk.f32.gmra.mxu2 %vm183_vm2, %v314_v46 }
 0x34c   :  { %v342_v47 = vpop.f32.mrf.mxu2 }
 0x354   :  { %v345_v48 = vpop.f32.mrf.mxu2 }
 0x355   :  { %366 = vmatpush.msra.mxu1 %v345_v48 }
 0x357   :  { %367 = vmatpush.msra.mxu1 %v342_v47 }
 0x358   :  { %540 = vmatmul.msk.f32.vlgmr.msra.gmra.mxu1 %vm217_vm3, %v133_v17 }
 0x360   :  { %541 = vmatmul.msk.f32.gmra.mxu1 %vm217_vm3, %v134_v18  ;;  %v474_v18 = vld [vmem:[%s956_s15] sm:$0xff]  ;;  %s515_s15 = sshll.u32 %s958_s17, 4  ;;  %s516_s15 = int_to_ptr.hbm [resolvable:$true] %s515_s15 }
 0x361   :  { %502 = vmatpush.msra.mxu2 %v474_v18 }
 0x3d5   :  { %v369_v49 = vpop.f32.mrf.mxu1 }
 0x3d6   :  { %v370_v51 = vadd.f32 %v559_v50, %v369_v49 }
 0x3d8   :  { %v375_v54 = vmax.f32 %v370_v51, 0.0 }
 0x3da   :  { %v377_v57 = vadd.f32 %v375_v54, %v313_v42 }
 0x3dd   :  { %v372_v52 = vpop.f32.mrf.mxu1 }
 0x3de   :  { %v373_v53 = vadd.f32 %v559_v50, %v372_v52 }
 0x3e0   :  { %v376_v55 = vmax.f32 %v373_v53, 0.0 }
 0x3e2   :  { %v378_v56 = vadd.f32 %v376_v55, %v314_v46 }
 0x3e4   :  { %397 = vmatpush.msrb.mxu3 %v378_v56 }
 0x3e6   :  { %398 = vmatpush.msrb.mxu3 %v377_v57 }
 0x3e7   :  { %542 = vmatmul.msk.f32.vlgmr.msrb.gmra.mxu3 %vm217_vm3, %v379_v58 }
 0x3e8   :  { %426 = vmatpush.msra.mxu3 %v406_v59 }
 0x3ea   :  { %427 = vmatpush.msra.mxu3 %v405_v60 }
 0x3ec   :  { %428 = vmatpush.msra.mxu3 %v404_v61 }
 0x3ee   :  { %429 = vmatpush.msra.mxu3 %v403_v62 }
 0x46a   :  { %v400_v6 = vpop.f32.mrf.mxu3 }
 0x46b   :  { %543 = vmatmul.msk.f32.vlgmr.msra.gmra.mxu3 %vm183_vm2, %v400_v6 }
 0x4ee   :  { %v431_v15 = vpop.f32.mrf.mxu3 }
 0x4ef   :  { %v432_v16 = vadd.f32 %v560_v14, %v431_v15 }
 0x4f1   :  { %v434_v17 = vmax.f32 %v432_v16, 0.0 }
 0x4f3   :  { %544 = vmatmul.msk.f32.vlgmr.msra.gmra.mxu0 %vm449_vm4, %v434_v17 }
 0x570   :  { %v470_v20 = vpop.f32.mrf.mxu0 }
 0x571   :  { %v471_v21 = vadd.f32 %v561_v19, %v470_v20 }
 0x573   :  { %v473_v22 = vmax.f32 %v471_v21, 0.0 }
 0x575   :  { %545 = vmatmul.msk.f32.vlgmr.msra.gmra.mxu2 %vm483_vm5, %v473_v22 }
 0x5f8   :  { %v504_v24 = vpop.f32.mrf.mxu2 }
 0x5f9   :  { %v505_v25 = vadd.f32 %v562_v23, %v504_v24 }
 0x5fb   :  { %507 = vst [vmem:[#allocation11] sm:$0xf] %v505_v25 }
 0x5fc   :  { %518 = dma.vmem_to_hbm [thread:$0]  %s514_s0, 64, %s516_s15, [#allocation4]  }
 0x5fd   :  { %713 = dma.done.wait [#allocation4], 64  }
 0x5fe   :  { %714 = vsyncadd [#allocation4], 4294967232 }
 0x5ff   :  { %523 = vsyncpa [#allocation3], 1 }
 0x600   :  { %524 = vsyncpa [#allocation6], 1 }
 0x601   :  { %525 = vsyncpa [#allocation9], 1 }
 0x602   :  { %526 = vsyncpa [#allocation4], 1 }

</bundles_post_ra>
